<compile_context>
chip_gen: v5e
topology: v5e:2x2
jax: 0.10.0
libtpu: 0.0.40
codegen_flags: <defaults>
</compile_context>

<pallas_src>
import functools
import math

import jax
import jax.numpy as jnp
from jax import lax
from jax.experimental import pallas as pl
from jax.experimental.pallas import tpu as pltpu


# ----------------------------------------------------------------------------
# Parameter / buffer construction (deterministic, plain JAX glue)
# ----------------------------------------------------------------------------
def make_positional_encoding(d_model: int, max_len: int) -> jnp.ndarray:
    """Builds the (max_len, 1, d_model) sinusoidal buffer exactly like torch."""
    position = jnp.arange(0, max_len, dtype=jnp.float32)[:, None]          # (L, 1)
    div_term = jnp.exp(
        jnp.arange(0, d_model, 2, dtype=jnp.float32)
        * (-math.log(10000.0) / d_model)
    )                                                                        # (D/2,)
    pe = jnp.zeros((max_len, d_model), dtype=jnp.float32)
    pe = pe.at[:, 0::2].set(jnp.sin(position * div_term))
    pe = pe.at[:, 1::2].set(jnp.cos(position * div_term))
    # unsqueeze(0).transpose(0, 1) -> (max_len, 1, d_model)
    return pe[:, None, :]


# ----------------------------------------------------------------------------
# Pallas kernels
# ----------------------------------------------------------------------------
def _hash_u32(x):
    """xorshift-multiply finalizer; plain VPU int ops (works on TPU + interpret)."""
    x = x ^ (x >> 16)
    x = x * jnp.uint32(0x7FEB352D)
    x = x ^ (x >> 15)
    x = x * jnp.uint32(0x846CA68B)
    x = x ^ (x >> 16)
    return x


def _pe_add_kernel(x_ref, pe_ref, o_ref):
    # (TS, B, D) + (TS, 1, D): broadcast over the batch axis, compute in f32.
    o_ref[...] = (x_ref[...].astype(jnp.float32) + pe_ref[...]).astype(o_ref.dtype)


def _pe_add_dropout_kernel(seed_ref, x_ref, pe_ref, o_ref, *, p, tile_rows):
    ts, B, D = x_ref.shape
    y = x_ref[...].astype(jnp.float32) + pe_ref[...]

    # Counter-based PRNG: hash(seed, global element index).  Per-tile
    # decorrelated (global row offset folded in) and independent of tiling.
    # TODO(synk): not bit-identical to torch's dropout RNG stream (no clean equivalent).
    shape = (ts, B, D)
    r = lax.broadcasted_iota(jnp.uint32, shape, 0)
    b = lax.broadcasted_iota(jnp.uint32, shape, 1)
    c = lax.broadcasted_iota(jnp.uint32, shape, 2)
    row0 = pl.program_id(0).astype(jnp.uint32) * jnp.uint32(tile_rows)
    gidx = ((row0 + r) * jnp.uint32(B) + b) * jnp.uint32(D) + c
    seed = seed_ref[0].astype(jnp.uint32) * jnp.uint32(0x9E3779B9)
    bits = _hash_u32(gidx ^ seed)

    # Integer-threshold dropout: drop iff bits < p * 2^32 (select-free mask mul).
    thresh = jnp.uint32(min(int(round(p * 4294967296.0)), 4294967295))
    keep = (bits >= thresh).astype(jnp.float32)
    scale = jnp.float32(1.0 / (1.0 - p))
    o_ref[...] = (y * (keep * scale)).astype(o_ref.dtype)


# ----------------------------------------------------------------------------
# Wrapper
# ----------------------------------------------------------------------------
def _pick_seq_tile(S, B, D, itemsize):
    # Per-step working set: x tile + out tile (+ small pe tile), double-buffered
    # by the Pallas pipeline.  Keep it << v7x's 64 MiB physical VMEM.
    bytes_per_row = 2 * B * D * max(int(itemsize), 4) + D * 4
    ts = min(S, 512)
    while ts > 8 and 2 * ts * bytes_per_row > (8 << 20):
        ts //= 2
    return max(ts, 1)


def positional_encoding_forward(x, pe_buffer, *, dropout_p=0.1,
                                training=False, seed=0):
    """x: (S, B, D); pe_buffer: (max_len, 1, D) float32."""
    S, B, D = x.shape
    pe_slice = pe_buffer[:S]  # (S, 1, D) -- glue slicing, like pe[:x.shape[0], :]

    ts = _pick_seq_tile(S, B, D, x.dtype.itemsize)
    grid = (pl.cdiv(S, ts),)

    x_spec = pl.BlockSpec((ts, B, D), lambda i, *_: (i, 0, 0))
    pe_spec = pl.BlockSpec((ts, 1, D), lambda i, *_: (i, 0, 0))
    o_spec = pl.BlockSpec((ts, B, D), lambda i, *_: (i, 0, 0))
    out_shape = jax.ShapeDtypeStruct((S, B, D), x.dtype)

    cparams = pltpu.CompilerParams(
        dimension_semantics=("parallel",),       # shard seq tiles across v7x's 2 TCs
        vmem_limit_bytes=32 * 1024 * 1024,       # explicit, safe on 64 MiB v7x VMEM
    )

    if (not training) or dropout_p == 0.0:
        # Inference: dropout is identity -> plain grid, no scalar prefetch.
        return pl.pallas_call(
            _pe_add_kernel,
            out_shape=out_shape,
            grid=grid,
            in_specs=[x_spec, pe_spec],
            out_specs=o_spec,
            compiler_params=cparams,
        )(x, pe_slice)

    # Training: inverted dropout, scale 1/(1-p).
    seed_arr = jnp.array([seed], dtype=jnp.int32)
    kernel = functools.partial(_pe_add_dropout_kernel,
                               p=float(dropout_p), tile_rows=ts)
    return pl.pallas_call(
        kernel,
        out_shape=out_shape,
        grid_spec=pltpu.PrefetchScalarGridSpec(
            num_scalar_prefetch=1,
            grid=grid,
            in_specs=[x_spec, pe_spec],
            out_specs=o_spec,
        ),
        compiler_params=cparams,
    )(seed_arr, x, pe_slice)


# ----------------------------------------------------------------------------
# Main
# ----------------------------------------------------------------------------
if __name__ == "__main__":
    d_model = 32
    max_len = 64        # small max_len for the synthetic buffer (default is 5000)
    seq_len = 8
    batch = 2

    key = jax.random.PRNGKey(0)
    x = jax.random.normal(key, (seq_len, batch, d_model), dtype=jnp.float32)
    pe_buf = make_positional_encoding(d_model, max_len)
    ref = x + pe_buf[:seq_len]

    # Eval-mode forward (dropout = identity) -- deterministic, checkable.
    out = positional_encoding_forward(x, pe_buf, dropout_p=0.1, training=False)
    out = jax.block_until_ready(out)
    assert out.shape == (seq_len, batch, d_model)
    assert jnp.allclose(out, ref, atol=1e-6, rtol=1e-6)

    # Training-mode forward: every element is either 0 or (x+pe)/(1-p).
    p = 0.1
    out_drop = positional_encoding_forward(
        x, pe_buf, dropout_p=p, training=True, seed=0)
    out_drop = jax.block_until_ready(out_drop)
    assert out_drop.shape == (seq_len, batch, d_model)
    scale = 1.0 / (1.0 - p)
    is_zero = jnp.isclose(out_drop, 0.0, atol=1e-6)
    is_scaled = jnp.isclose(out_drop, ref * scale, atol=1e-5, rtol=1e-5)
    assert bool(jnp.all(is_zero | is_scaled))

    print("KERNEL_OK")
</pallas_src>

<mosaic_0001>
module attributes {stable_mosaic.version = 11 : i64} {
  func.func @_pe_add_kernel(%arg0: i32, %arg1: memref<8x2x32xf32, #tpu.memory_space<vmem>>, %arg2: memref<8x1x32xf32, #tpu.memory_space<vmem>>, %arg3: memref<8x2x32xf32, #tpu.memory_space<vmem>>) attributes {dimension_semantics = [#tpu.dimension_semantics<parallel>], iteration_bounds = array<i64: 1>, scalar_prefetch = 0 : i64, scratch_operands = 0 : i64, tpu.core_type = #tpu.core_type<tc>, window_params = [{transform_indices = @transform_0, window_bounds = array<i64: 8, 2, 32>}, {transform_indices = @transform_1, window_bounds = array<i64: 8, 1, 32>}, {transform_indices = @transform_2, window_bounds = array<i64: 8, 2, 32>}]} {
    %c0 = arith.constant 0 : index
    %c0_0 = arith.constant 0 : index
    %c0_1 = arith.constant 0 : index
    %0 = vector.load %arg1[%c0, %c0_0, %c0_1] : memref<8x2x32xf32, #tpu.memory_space<vmem>>, vector<8x2x32xf32>
    %c0_2 = arith.constant 0 : index
    %c0_3 = arith.constant 0 : index
    %c0_4 = arith.constant 0 : index
    %1 = vector.load %arg2[%c0_2, %c0_3, %c0_4] : memref<8x1x32xf32, #tpu.memory_space<vmem>>, vector<8x1x32xf32>
    %2 = vector.broadcast %1 : vector<8x1x32xf32> to vector<8x2x32xf32>
    %3 = arith.addf %0, %2 : vector<8x2x32xf32>
    %c0_5 = arith.constant 0 : index
    %c0_6 = arith.constant 0 : index
    %c0_7 = arith.constant 0 : index
    %4 = vector.load %arg3[%c0_5, %c0_6, %c0_7] : memref<8x2x32xf32, #tpu.memory_space<vmem>>, vector<8x2x32xf32>
    tpu.vector_store %arg3[%c0_5, %c0_6, %c0_7], %3 {strides = array<i32>} : memref<8x2x32xf32, #tpu.memory_space<vmem>>, vector<8x2x32xf32>,
    return
  }
  func.func @transform_0(%arg0: i32) -> (i32, i32, i32) {
    %c0_i32 = arith.constant 0 : i32
    %c0_i32_0 = arith.constant 0 : i32
    %c0_i32_1 = arith.constant 0 : i32
    return %arg0, %c0_i32, %c0_i32_0 : i32, i32, i32
  }
  func.func @transform_1(%arg0: i32) -> (i32, i32, i32) {
    %c0_i32 = arith.constant 0 : i32
    %c0_i32_0 = arith.constant 0 : i32
    %c0_i32_1 = arith.constant 0 : i32
    return %arg0, %c0_i32, %c0_i32_0 : i32, i32, i32
  }
  func.func @transform_2(%arg0: i32) -> (i32, i32, i32) {
    %c0_i32 = arith.constant 0 : i32
    %c0_i32_0 = arith.constant 0 : i32
    %c0_i32_1 = arith.constant 0 : i32
    return %arg0, %c0_i32, %c0_i32_0 : i32, i32, i32
  }
}

</mosaic_0001>

<bundles_post_ra>
// kernel: tpu_custom_call.1
= control target key start
LH: loop header
LB: loop body
LE: loop exit
PB: predicated region body
PF: predicated region fallthrough
CT: control target
= control target key end

     0   :  { %7 = vsyncpa [#allocation3], 0  ;;  %s266_s0 = inlined_call_operand.hbm [shape: f32[8,2,32], index: 0, kind: input, shape index: {}]   ;;  %s267_s1 = inlined_call_operand.hbm [shape: f32[8,1,32], index: 1, kind: input, shape index: {}]   ;;  %s268_s2 = inlined_call_operand.hbm [shape: f32[8,2,32], index: 2, kind: output, shape index: {}]  }
   0x1   :  { %8 = vsyncpa [#allocation6], 0 }
   0x2   :  { %9 = vsyncpa [#allocation4], 0  ;;  %s14_s11 = sshll.u32 %s266_s0, 4  ;;  %s214_s12 = smov [#allocation2]   ;;  %s15_s11 = int_to_ptr.hbm [resolvable:$true] %s14_s11 }
   0x3   :  { %s16_s13 = sshll.u32 %s214_s12, 4  ;;  %s27_s16 = sshll.u32 %s267_s1, 4  ;;  %s17_s13 = int_to_ptr.vmem [resolvable:$true] %s16_s13  ;;  %s28_s16 = int_to_ptr.hbm [resolvable:$true] %s27_s16 }
   0x4   :  { %s215_s17 = smov 32   ;;  %s216_s18 = smov 2  }
   0x5   :  { %22 = dma.hbm_to_vmem [thread:$0]  %s15_s11, 256, %s17_s13, [#allocation3], %s215_s17, %s215_s17, %s216_s18  }
   0x6   :  { %s217_s19 = smov [#allocation5]   ;;  %s218_s21 = smov 16  }
   0x7   :  { %s29_s20 = sshll.u32 %s217_s19, 4  ;;  %s219_s0 = smov 1   ;;  %s30_s20 = int_to_ptr.vmem [resolvable:$true] %s29_s20 }
   0x8   :  { %35 = dma.hbm_to_vmem [thread:$0]  %s28_s16, 128, %s30_s20, [#allocation6], %s218_s21, %s218_s21, %s219_s0  }
   0x9   :  { %208 = dma.done.wait [#allocation3], 256  }
   0xa   :  { %209 = vsyncadd [#allocation3], 4294967040 }
   0xb   :  { %210 = dma.done.wait [#allocation6], 128  }
   0xc   :  { %211 = vsyncadd [#allocation6], 4294967168  ;;  %vm92_vm0 = vcmask 254976   ;;  %s220_s22 = smov [#allocation7]   ;;  %s107_s25 = sshll.u32 %s268_s2, 4  ;;  %s108_s25 = int_to_ptr.hbm [resolvable:$true] %s107_s25 }
   0xd   :  { %s245_s1 = sshll.u32 %s220_s22, 4  ;;  %v44_v0 = vld [vmem:[#allocation2] sm:$0x3]  ;;  %v128_v1 = vld [vmem:[#allocation5] ss:$0 sm:$0xff]  ;;  %s106_s1 = int_to_ptr.vmem [resolvable:$true] %s245_s1 }
   0xe   :  { %v45_v2 = vld [vmem:[#allocation2 + $0x2] sm:$0x3]  ;;  %v129_v3 = vld [vmem:[#allocation5 + $0x1] ss:$0 sm:$0xff]  ;;  %v84_v4 = vadd.f32 %v128_v1, %v44_v0  ;;  %v46_v5 = vld [vmem:[#allocation2 + $0x4] sm:$0x3] }
   0xf   :  { %v130_v6 = vld [vmem:[#allocation5 + $0x2] ss:$0 sm:$0xff]  ;;  %v85_v7 = vadd.f32 %v129_v3, %v45_v2  ;;  %v47_v8 = vld [vmem:[#allocation2 + $0x6] sm:$0x3]  ;;  %v131_v9 = vld [vmem:[#allocation5 + $0x3] ss:$0 sm:$0xff] }
  0x10   :  { %93 = vst.msk [vmem:[#allocation7] sm:$0x3] %vm92_vm0, %v84_v4  ;;  %v86_v10 = vadd.f32 %v130_v6, %v46_v5  ;;  %v48_v11 = vld [vmem:[#allocation2 + $0x8] sm:$0x3]  ;;  %v87_v12 = vadd.f32 %v131_v9, %v47_v8  ;;  %v132_v13 = vld [vmem:[#allocation5 + $0x4] ss:$0 sm:$0xff] }
  0x11   :  { %94 = vst.msk [vmem:[#allocation7 + $0x2] sm:$0x3] %vm92_vm0, %v85_v7  ;;  %v49_v14 = vld [vmem:[#allocation2 + $0xa] sm:$0x3]  ;;  %v133_v15 = vld [vmem:[#allocation5 + $0x5] ss:$0 sm:$0xff]  ;;  %v88_v16 = vadd.f32 %v132_v13, %v48_v11 }
  0x12   :  { %95 = vst.msk [vmem:[#allocation7 + $0x4] sm:$0x3] %vm92_vm0, %v86_v10  ;;  %v50_v17 = vld [vmem:[#allocation2 + $0xc] sm:$0x3]  ;;  %v89_v18 = vadd.f32 %v133_v15, %v49_v14  ;;  %v134_v19 = vld [vmem:[#allocation5 + $0x6] ss:$0 sm:$0xff] }
  0x13   :  { %96 = vst.msk [vmem:[#allocation7 + $0x6] sm:$0x3] %vm92_vm0, %v87_v12  ;;  %v51_v20 = vld [vmem:[#allocation2 + $0xe] sm:$0x3]  ;;  %v135_v21 = vld [vmem:[#allocation5 + $0x7] ss:$0 sm:$0xff]  ;;  %v90_v22 = vadd.f32 %v134_v19, %v50_v17 }
  0x14   :  { %97 = vst.msk [vmem:[#allocation7 + $0x8] sm:$0x3] %vm92_vm0, %v88_v16  ;;  %v91_v23 = vadd.f32 %v135_v21, %v51_v20 }
  0x15   :  { %98 = vst.msk [vmem:[#allocation7 + $0xa] sm:$0x3] %vm92_vm0, %v89_v18 }
  0x16   :  { %99 = vst.msk [vmem:[#allocation7 + $0xc] sm:$0x3] %vm92_vm0, %v90_v22 }
  0x17   :  { %100 = vst.msk [vmem:[#allocation7 + $0xe] sm:$0x3] %vm92_vm0, %v91_v23 }
  0x18   :  { %113 = dma.vmem_to_hbm [thread:$0]  %s106_s1, 256, %s108_s25, [#allocation4], %s215_s17, %s215_s17, %s216_s18  }
  0x19   :  { %212 = dma.done.wait [#allocation4], 256  }
  0x1a   :  { %213 = vsyncadd [#allocation4], 4294967040 }
  0x1b   :  { %118 = vsyncpa [#allocation3], 1 }
  0x1c   :  { %119 = vsyncpa [#allocation6], 1 }
  0x1d   :  { %120 = vsyncpa [#allocation4], 1 }

</bundles_post_ra>
